<compile_context>
chip_gen: v6e
topology: v6e:2x2x1
jax: 0.10.0
libtpu: 0.0.40
codegen_flags: <defaults>
</compile_context>

<pallas_src>
import math

import jax
import jax.numpy as jnp
from jax.experimental import pallas as pl
from jax.experimental.pallas import tpu as pltpu


def _nearest_counts(out_size: int, in_size: int):
    """counts[i] = #dst pixels d with floor(d * in / out) == i  (static Python)."""
    counts = [0] * in_size
    for d in range(out_size):
        counts[(d * in_size) // out_size] += 1
    return counts


def _nearest_groups(out_size: int, in_size: int):
    """Per source index: (start, count) of the contiguous dst range mapping to it."""
    groups, start = [], 0
    for c in _nearest_counts(out_size, in_size):
        groups.append((start, c))
        start += c
    return groups


def _make_cbfuse_kernel(num_srcs, th, wt, src_block_dims, w_counts, h_groups):
    """Per-grid-step kernel body; all replication tables are static Python."""

    def kernel(*refs):
        src_refs = refs[:num_srcs]
        tgt_ref = refs[num_srcs]
        out_ref = refs[num_srcs + 1]
        acc_ref = refs[num_srcs + 2]                      # (th, Wt, C) f32 scratch
        c = out_ref.shape[-1]

        # f32 accumulator initialized from the target block.
        acc_ref[...] = tgt_ref[0].astype(jnp.float32)

        for i in range(num_srcs):
            th_src, wi_dim = src_block_dims[i]
            x = src_refs[i][0]                            # (th_src, Wi, C), native dtype

            # ---- W (sublane) nearest resize: static row replication ----------
            if wi_dim == wt:
                xw = x
            else:
                pieces = [
                    jnp.broadcast_to(x[:, wi:wi + 1, :], (th_src, cnt, c))
                    for wi, cnt in enumerate(w_counts[i]) if cnt
                ]
                xw = pieces[0] if len(pieces) == 1 else jnp.concatenate(pieces, axis=1)
                # xw: (th_src, Wt, C)

            # ---- H (major-axis) nearest resize: add row groups into acc ------
            if th_src == th:                              # source H == target H
                acc_ref[...] = acc_ref[...] + xw.astype(jnp.float32)
            else:
                for hs, (start, cnt) in enumerate(h_groups[i]):
                    if cnt == 0:
                        continue
                    sl = (pl.ds(start, cnt), slice(None), slice(None))
                    rep = jnp.broadcast_to(xw[hs:hs + 1, :, :], (cnt, wt, c))
                    acc_ref[sl] = acc_ref[sl] + rep.astype(jnp.float32)

        out_ref[0] = acc_ref[...].astype(out_ref.dtype)

    return kernel


def _choose_th(ht, src_h, n, block_bytes_fn, budget_bytes=10 * 2**20, desired_steps=4):
    """Pick TH target rows/block: exact source blocks, VMEM budget, >=2 grid steps."""
    lcm = 1
    for hi in src_h:
        step = ht // math.gcd(ht, hi)     # smallest TH with TH*Hi % Ht == 0; divides Ht
        lcm = lcm * step // math.gcd(lcm, step)
    valid = [t for t in range(lcm, ht + 1, lcm) if ht % t == 0]
    fitting = [t for t in valid if block_bytes_fn(t) <= budget_bytes] or [min(valid)]
    preferred = [t for t in fitting if n * (ht // t) >= desired_steps]
    th = max(preferred) if preferred else max(fitting)
    if n * (ht // th) < 2:                # guarantee >=2 steps when possible (v7x cores)
        smaller = [t for t in fitting if ht // t >= 2]
        if smaller:
            th = max(smaller)
    return th


def cbfuse(x_list, index, mode: str = "nearest"):
    """Pallas implementation of CBFuse.forward (NCHW in, NCHW out)."""
    assert mode == "nearest", "only 'nearest' interpolation is implemented"
    target = x_list[-1]
    n, c, ht, wt = (int(s) for s in target.shape)
    dtype = target.dtype

    picked = [x[pick_id] for pick_id, x in zip(index, x_list)]
    for p in picked:
        assert tuple(p.shape[:2]) == (n, c)
    src_hw = [(int(p.shape[2]), int(p.shape[3])) for p in picked]
    num_srcs = len(picked)

    # Lane-dense channel-last layout: (N, H, W, C); C sits in the 128-lane dim.
    tgt_nhwc = jnp.transpose(target, (0, 2, 3, 1))
    srcs_nhwc = [jnp.transpose(p, (0, 2, 3, 1)) for p in picked]

    itemsize = jnp.dtype(dtype).itemsize

    def _pad(v, m):
        return ((v + m - 1) // m) * m

    def _block_bytes(th):
        # Double-buffered streamed blocks (padded to (8,128) tiles) + f32 scratch.
        src = sum((th * hi) // ht * _pad(wi, 8) * _pad(c, 128) for hi, wi in src_hw)
        tgt_out = 2 * th * _pad(wt, 8) * _pad(c, 128)
        scratch = th * _pad(wt, 8) * _pad(c, 128) * 4
        return 2 * (src + tgt_out) * itemsize + scratch

    th = _choose_th(ht, [h for h, _ in src_hw], n, _block_bytes)
    grid = (n, ht // th)

    src_block_dims = [((th * hi) // ht, wi) for hi, wi in src_hw]     # exact by TH choice
    w_counts = [_nearest_counts(wt, wi) for _, wi in src_hw]
    h_groups = [_nearest_groups(th, th_src) for th_src, _ in src_block_dims]

    in_specs = [
        pl.BlockSpec((1, th_src, wi, c), lambda ni, hb: (ni, hb, 0, 0))
        for th_src, wi in src_block_dims
    ]
    in_specs.append(pl.BlockSpec((1, th, wt, c), lambda ni, hb: (ni, hb, 0, 0)))
    out_spec = pl.BlockSpec((1, th, wt, c), lambda ni, hb: (ni, hb, 0, 0))

    est = _block_bytes(th)
    vmem_limit = min(48 * 2**20, max(2 * est, 32 * 2**20)) if est > 12 * 2**20 else None

    out_nhwc = pl.pallas_call(
        _make_cbfuse_kernel(num_srcs, th, wt, src_block_dims, w_counts, h_groups),
        out_shape=jax.ShapeDtypeStruct((n, ht, wt, c), dtype),
        grid=grid,
        in_specs=in_specs,
        out_specs=out_spec,
        scratch_shapes=[pltpu.VMEM((th, wt, c), jnp.float32)],
        input_output_aliases={num_srcs: 0},               # reuse target buffer as output
        compiler_params=pltpu.CompilerParams(
            dimension_semantics=("parallel", "parallel"),
            vmem_limit_bytes=vmem_limit),
    )(*srcs_nhwc, tgt_nhwc)

    return jnp.transpose(out_nhwc, (0, 3, 1, 2))


def _reference_cbfuse(x_list, index):
    """Plain-JAX reference matching torch.nn.functional.interpolate(mode='nearest')."""
    target = x_list[-1]
    ht, wt = target.shape[2], target.shape[3]
    acc = target.astype(jnp.float32)
    for pick_id, x in zip(index, x_list):
        p = x[pick_id]
        hi, wi = p.shape[2], p.shape[3]
        src_h = (jnp.arange(ht) * hi) // ht
        src_w = (jnp.arange(wt) * wi) // wt
        up = jnp.take(jnp.take(p, src_h, axis=2), src_w, axis=3)
        acc = acc + up.astype(jnp.float32)
    return acc.astype(target.dtype)


if __name__ == "__main__":
    key = jax.random.PRNGKey(0)
    k0, k1, k2, k3, k4 = jax.random.split(key, 5)

    n, c = 2, 64
    ht, wt = 16, 16

    # x_list structure mirroring CBFuse usage: tuples of candidate feature maps
    # for the "previous layer" entries, plain tensor for the target (last).
    a0 = jax.random.normal(k0, (n, c, 8, 8), dtype=jnp.float32)
    a1 = jax.random.normal(k1, (n, c, 8, 8), dtype=jnp.float32)
    b0 = jax.random.normal(k2, (n, c, 4, 4), dtype=jnp.float32)
    b1 = jax.random.normal(k3, (n, c, 6, 6), dtype=jnp.float32)   # non-integer ratio path
    target = jax.random.normal(k4, (n, c, ht, wt), dtype=jnp.float32)

    index = [0, 1]                       # CBFuse.idx
    x_list = [(a0, a1), (b0, b1), target]

    out = cbfuse(x_list, index, mode="nearest")
    out = jax.block_until_ready(out)

    ref = _reference_cbfuse(x_list, index)
    assert out.shape == (n, c, ht, wt)
    assert out.dtype == target.dtype
    assert jnp.allclose(out, ref, atol=1e-5, rtol=1e-5), "mismatch vs reference"

    print("KERNEL_OK")
</pallas_src>

<mosaic_0001>
module attributes {stable_mosaic.version = 11 : i64} {
  func.func @kernel(%arg0: i32, %arg1: i32, %arg2: memref<1x4x8x64xf32, #tpu.memory_space<vmem>>, %arg3: memref<1x3x6x64xf32, #tpu.memory_space<vmem>>, %arg4: memref<1x8x16x64xf32, #tpu.memory_space<vmem>>, %arg5: memref<1x8x16x64xf32, #tpu.memory_space<vmem>>, %arg6: memref<8x16x64xf32, #tpu.memory_space<vmem>>) attributes {dimension_semantics = [#tpu.dimension_semantics<parallel>, #tpu.dimension_semantics<parallel>], iteration_bounds = array<i64: 2, 2>, scalar_prefetch = 0 : i64, scratch_operands = 1 : i64, tpu.core_type = #tpu.core_type<tc>, window_params = [{transform_indices = @transform_0, window_bounds = array<i64: 1, 4, 8, 64>}, {transform_indices = @transform_1, window_bounds = array<i64: 1, 3, 6, 64>}, {transform_indices = @transform_2, window_bounds = array<i64: 1, 8, 16, 64>}, {transform_indices = @transform_3, window_bounds = array<i64: 1, 8, 16, 64>}]} {
    %c0 = arith.constant 0 : index
    %c0_0 = arith.constant 0 : index
    %c0_1 = arith.constant 0 : index
    %c0_2 = arith.constant 0 : index
    %0 = vector.load %arg4[%c0, %c0_0, %c0_1, %c0_2] : memref<1x8x16x64xf32, #tpu.memory_space<vmem>>, vector<1x8x16x64xf32>
    %1 = vector.shape_cast %0 : vector<1x8x16x64xf32> to vector<8x16x64xf32>
    %c0_3 = arith.constant 0 : index
    %c0_4 = arith.constant 0 : index
    %c0_5 = arith.constant 0 : index
    %2 = vector.load %arg6[%c0_3, %c0_4, %c0_5] : memref<8x16x64xf32, #tpu.memory_space<vmem>>, vector<8x16x64xf32>
    tpu.vector_store %arg6[%c0_3, %c0_4, %c0_5], %1 {strides = array<i32>} : memref<8x16x64xf32, #tpu.memory_space<vmem>>, vector<8x16x64xf32>,
    %c0_6 = arith.constant 0 : index
    %c0_7 = arith.constant 0 : index
    %c0_8 = arith.constant 0 : index
    %c0_9 = arith.constant 0 : index
    %3 = vector.load %arg2[%c0_6, %c0_7, %c0_8, %c0_9] : memref<1x4x8x64xf32, #tpu.memory_space<vmem>>, vector<1x4x8x64xf32>
    %4 = vector.shape_cast %3 : vector<1x4x8x64xf32> to vector<4x8x64xf32>
    %5 = vector.extract_strided_slice %4 {offsets = [0, 0, 0], sizes = [4, 1, 64], strides = [1, 1, 1]} : vector<4x8x64xf32> to vector<4x1x64xf32>
    %6 = vector.shape_cast %5 : vector<4x1x64xf32> to vector<4x1x64xf32>
    %7 = vector.broadcast %6 : vector<4x1x64xf32> to vector<4x2x64xf32>
    %8 = vector.extract_strided_slice %4 {offsets = [0, 1, 0], sizes = [4, 1, 64], strides = [1, 1, 1]} : vector<4x8x64xf32> to vector<4x1x64xf32>
    %9 = vector.shape_cast %8 : vector<4x1x64xf32> to vector<4x1x64xf32>
    %10 = vector.broadcast %9 : vector<4x1x64xf32> to vector<4x2x64xf32>
    %11 = vector.extract_strided_slice %4 {offsets = [0, 2, 0], sizes = [4, 1, 64], strides = [1, 1, 1]} : vector<4x8x64xf32> to vector<4x1x64xf32>
    %12 = vector.shape_cast %11 : vector<4x1x64xf32> to vector<4x1x64xf32>
    %13 = vector.broadcast %12 : vector<4x1x64xf32> to vector<4x2x64xf32>
    %14 = vector.extract_strided_slice %4 {offsets = [0, 3, 0], sizes = [4, 1, 64], strides = [1, 1, 1]} : vector<4x8x64xf32> to vector<4x1x64xf32>
    %15 = vector.shape_cast %14 : vector<4x1x64xf32> to vector<4x1x64xf32>
    %16 = vector.broadcast %15 : vector<4x1x64xf32> to vector<4x2x64xf32>
    %17 = vector.extract_strided_slice %4 {offsets = [0, 4, 0], sizes = [4, 1, 64], strides = [1, 1, 1]} : vector<4x8x64xf32> to vector<4x1x64xf32>
    %18 = vector.shape_cast %17 : vector<4x1x64xf32> to vector<4x1x64xf32>
    %19 = vector.broadcast %18 : vector<4x1x64xf32> to vector<4x2x64xf32>
    %20 = vector.extract_strided_slice %4 {offsets = [0, 5, 0], sizes = [4, 1, 64], strides = [1, 1, 1]} : vector<4x8x64xf32> to vector<4x1x64xf32>
    %21 = vector.shape_cast %20 : vector<4x1x64xf32> to vector<4x1x64xf32>
    %22 = vector.broadcast %21 : vector<4x1x64xf32> to vector<4x2x64xf32>
    %23 = vector.extract_strided_slice %4 {offsets = [0, 6, 0], sizes = [4, 1, 64], strides = [1, 1, 1]} : vector<4x8x64xf32> to vector<4x1x64xf32>
    %24 = vector.shape_cast %23 : vector<4x1x64xf32> to vector<4x1x64xf32>
    %25 = vector.broadcast %24 : vector<4x1x64xf32> to vector<4x2x64xf32>
    %26 = vector.extract_strided_slice %4 {offsets = [0, 7, 0], sizes = [4, 1, 64], strides = [1, 1, 1]} : vector<4x8x64xf32> to vector<4x1x64xf32>
    %27 = vector.shape_cast %26 : vector<4x1x64xf32> to vector<4x1x64xf32>
    %28 = vector.broadcast %27 : vector<4x1x64xf32> to vector<4x2x64xf32>
    %29 = tpu.concatenate %7, %10, %13, %16, %19, %22, %25, %28 in 1 : vector<4x2x64xf32>, vector<4x2x64xf32>, vector<4x2x64xf32>, vector<4x2x64xf32>, vector<4x2x64xf32>, vector<4x2x64xf32>, vector<4x2x64xf32>, vector<4x2x64xf32> -> vector<4x16x64xf32>
    %30 = vector.extract_strided_slice %29 {offsets = [0, 0, 0], sizes = [1, 16, 64], strides = [1, 1, 1]} : vector<4x16x64xf32> to vector<1x16x64xf32>
    %31 = vector.shape_cast %30 : vector<1x16x64xf32> to vector<1x16x64xf32>
    %32 = vector.broadcast %31 : vector<1x16x64xf32> to vector<2x16x64xf32>
    %c0_10 = arith.constant 0 : index
    %c0_11 = arith.constant 0 : index
    %c0_12 = arith.constant 0 : index
    %33 = vector.load %arg6[%c0_10, %c0_11, %c0_12] : memref<8x16x64xf32, #tpu.memory_space<vmem>>, vector<2x16x64xf32>
    %34 = arith.addf %33, %32 : vector<2x16x64xf32>
    %c0_13 = arith.constant 0 : index
    %c0_14 = arith.constant 0 : index
    %c0_15 = arith.constant 0 : index
    %35 = vector.load %arg6[%c0_13, %c0_14, %c0_15] : memref<8x16x64xf32, #tpu.memory_space<vmem>>, vector<2x16x64xf32>
    tpu.vector_store %arg6[%c0_13, %c0_14, %c0_15], %34 {strides = array<i32>} : memref<8x16x64xf32, #tpu.memory_space<vmem>>, vector<2x16x64xf32>,
    %36 = vector.extract_strided_slice %29 {offsets = [1, 0, 0], sizes = [1, 16, 64], strides = [1, 1, 1]} : vector<4x16x64xf32> to vector<1x16x64xf32>
    %37 = vector.shape_cast %36 : vector<1x16x64xf32> to vector<1x16x64xf32>
    %38 = vector.broadcast %37 : vector<1x16x64xf32> to vector<2x16x64xf32>
    %c2 = arith.constant 2 : index
    %c0_16 = arith.constant 0 : index
    %c0_17 = arith.constant 0 : index
    %39 = vector.load %arg6[%c2, %c0_16, %c0_17] : memref<8x16x64xf32, #tpu.memory_space<vmem>>, vector<2x16x64xf32>
    %40 = arith.addf %39, %38 : vector<2x16x64xf32>
    %c2_18 = arith.constant 2 : index
    %c0_19 = arith.constant 0 : index
    %c0_20 = arith.constant 0 : index
    %41 = vector.load %arg6[%c2_18, %c0_19, %c0_20] : memref<8x16x64xf32, #tpu.memory_space<vmem>>, vector<2x16x64xf32>
    tpu.vector_store %arg6[%c2_18, %c0_19, %c0_20], %40 {strides = array<i32>} : memref<8x16x64xf32, #tpu.memory_space<vmem>>, vector<2x16x64xf32>,
    %42 = vector.extract_strided_slice %29 {offsets = [2, 0, 0], sizes = [1, 16, 64], strides = [1, 1, 1]} : vector<4x16x64xf32> to vector<1x16x64xf32>
    %43 = vector.shape_cast %42 : vector<1x16x64xf32> to vector<1x16x64xf32>
    %44 = vector.broadcast %43 : vector<1x16x64xf32> to vector<2x16x64xf32>
    %c4 = arith.constant 4 : index
    %c0_21 = arith.constant 0 : index
    %c0_22 = arith.constant 0 : index
    %45 = vector.load %arg6[%c4, %c0_21, %c0_22] : memref<8x16x64xf32, #tpu.memory_space<vmem>>, vector<2x16x64xf32>
    %46 = arith.addf %45, %44 : vector<2x16x64xf32>
    %c4_23 = arith.constant 4 : index
    %c0_24 = arith.constant 0 : index
    %c0_25 = arith.constant 0 : index
    %47 = vector.load %arg6[%c4_23, %c0_24, %c0_25] : memref<8x16x64xf32, #tpu.memory_space<vmem>>, vector<2x16x64xf32>
    tpu.vector_store %arg6[%c4_23, %c0_24, %c0_25], %46 {strides = array<i32>} : memref<8x16x64xf32, #tpu.memory_space<vmem>>, vector<2x16x64xf32>,
    %48 = vector.extract_strided_slice %29 {offsets = [3, 0, 0], sizes = [1, 16, 64], strides = [1, 1, 1]} : vector<4x16x64xf32> to vector<1x16x64xf32>
    %49 = vector.shape_cast %48 : vector<1x16x64xf32> to vector<1x16x64xf32>
    %50 = vector.broadcast %49 : vector<1x16x64xf32> to vector<2x16x64xf32>
    %c6 = arith.constant 6 : index
    %c0_26 = arith.constant 0 : index
    %c0_27 = arith.constant 0 : index
    %51 = vector.load %arg6[%c6, %c0_26, %c0_27] : memref<8x16x64xf32, #tpu.memory_space<vmem>>, vector<2x16x64xf32>
    %52 = arith.addf %51, %50 : vector<2x16x64xf32>
    %c6_28 = arith.constant 6 : index
    %c0_29 = arith.constant 0 : index
    %c0_30 = arith.constant 0 : index
    %53 = vector.load %arg6[%c6_28, %c0_29, %c0_30] : memref<8x16x64xf32, #tpu.memory_space<vmem>>, vector<2x16x64xf32>
    tpu.vector_store %arg6[%c6_28, %c0_29, %c0_30], %52 {strides = array<i32>} : memref<8x16x64xf32, #tpu.memory_space<vmem>>, vector<2x16x64xf32>,
    %c0_31 = arith.constant 0 : index
    %c0_32 = arith.constant 0 : index
    %c0_33 = arith.constant 0 : index
    %c0_34 = arith.constant 0 : index
    %54 = vector.load %arg3[%c0_31, %c0_32, %c0_33, %c0_34] : memref<1x3x6x64xf32, #tpu.memory_space<vmem>>, vector<1x3x6x64xf32>
    %55 = vector.shape_cast %54 : vector<1x3x6x64xf32> to vector<3x6x64xf32>
    %56 = vector.extract_strided_slice %55 {offsets = [0, 0, 0], sizes = [3, 1, 64], strides = [1, 1, 1]} : vector<3x6x64xf32> to vector<3x1x64xf32>
    %57 = vector.shape_cast %56 : vector<3x1x64xf32> to vector<3x1x64xf32>
    %58 = vector.broadcast %57 : vector<3x1x64xf32> to vector<3x3x64xf32>
    %59 = vector.extract_strided_slice %55 {offsets = [0, 1, 0], sizes = [3, 1, 64], strides = [1, 1, 1]} : vector<3x6x64xf32> to vector<3x1x64xf32>
    %60 = vector.shape_cast %59 : vector<3x1x64xf32> to vector<3x1x64xf32>
    %61 = vector.broadcast %60 : vector<3x1x64xf32> to vector<3x3x64xf32>
    %62 = vector.extract_strided_slice %55 {offsets = [0, 2, 0], sizes = [3, 1, 64], strides = [1, 1, 1]} : vector<3x6x64xf32> to vector<3x1x64xf32>
    %63 = vector.shape_cast %62 : vector<3x1x64xf32> to vector<3x1x64xf32>
    %64 = vector.broadcast %63 : vector<3x1x64xf32> to vector<3x2x64xf32>
    %65 = vector.extract_strided_slice %55 {offsets = [0, 3, 0], sizes = [3, 1, 64], strides = [1, 1, 1]} : vector<3x6x64xf32> to vector<3x1x64xf32>
    %66 = vector.shape_cast %65 : vector<3x1x64xf32> to vector<3x1x64xf32>
    %67 = vector.broadcast %66 : vector<3x1x64xf32> to vector<3x3x64xf32>
    %68 = vector.extract_strided_slice %55 {offsets = [0, 4, 0], sizes = [3, 1, 64], strides = [1, 1, 1]} : vector<3x6x64xf32> to vector<3x1x64xf32>
    %69 = vector.shape_cast %68 : vector<3x1x64xf32> to vector<3x1x64xf32>
    %70 = vector.broadcast %69 : vector<3x1x64xf32> to vector<3x3x64xf32>
    %71 = vector.extract_strided_slice %55 {offsets = [0, 5, 0], sizes = [3, 1, 64], strides = [1, 1, 1]} : vector<3x6x64xf32> to vector<3x1x64xf32>
    %72 = vector.shape_cast %71 : vector<3x1x64xf32> to vector<3x1x64xf32>
    %73 = vector.broadcast %72 : vector<3x1x64xf32> to vector<3x2x64xf32>
    %74 = tpu.concatenate %58, %61, %64, %67, %70, %73 in 1 : vector<3x3x64xf32>, vector<3x3x64xf32>, vector<3x2x64xf32>, vector<3x3x64xf32>, vector<3x3x64xf32>, vector<3x2x64xf32> -> vector<3x16x64xf32>
    %75 = vector.extract_strided_slice %74 {offsets = [0, 0, 0], sizes = [1, 16, 64], strides = [1, 1, 1]} : vector<3x16x64xf32> to vector<1x16x64xf32>
    %76 = vector.shape_cast %75 : vector<1x16x64xf32> to vector<1x16x64xf32>
    %77 = vector.broadcast %76 : vector<1x16x64xf32> to vector<3x16x64xf32>
    %c0_35 = arith.constant 0 : index
    %c0_36 = arith.constant 0 : index
    %c0_37 = arith.constant 0 : index
    %78 = vector.load %arg6[%c0_35, %c0_36, %c0_37] : memref<8x16x64xf32, #tpu.memory_space<vmem>>, vector<3x16x64xf32>
    %79 = arith.addf %78, %77 : vector<3x16x64xf32>
    %c0_38 = arith.constant 0 : index
    %c0_39 = arith.constant 0 : index
    %c0_40 = arith.constant 0 : index
    %80 = vector.load %arg6[%c0_38, %c0_39, %c0_40] : memref<8x16x64xf32, #tpu.memory_space<vmem>>, vector<3x16x64xf32>
    tpu.vector_store %arg6[%c0_38, %c0_39, %c0_40], %79 {strides = array<i32>} : memref<8x16x64xf32, #tpu.memory_space<vmem>>, vector<3x16x64xf32>,
    %81 = vector.extract_strided_slice %74 {offsets = [1, 0, 0], sizes = [1, 16, 64], strides = [1, 1, 1]} : vector<3x16x64xf32> to vector<1x16x64xf32>
    %82 = vector.shape_cast %81 : vector<1x16x64xf32> to vector<1x16x64xf32>
    %83 = vector.broadcast %82 : vector<1x16x64xf32> to vector<3x16x64xf32>
    %c3 = arith.constant 3 : index
    %c0_41 = arith.constant 0 : index
    %c0_42 = arith.constant 0 : index
    %84 = vector.load %arg6[%c3, %c0_41, %c0_42] : memref<8x16x64xf32, #tpu.memory_space<vmem>>, vector<3x16x64xf32>
    %85 = arith.addf %84, %83 : vector<3x16x64xf32>
    %c3_43 = arith.constant 3 : index
    %c0_44 = arith.constant 0 : index
    %c0_45 = arith.constant 0 : index
    %86 = vector.load %arg6[%c3_43, %c0_44, %c0_45] : memref<8x16x64xf32, #tpu.memory_space<vmem>>, vector<3x16x64xf32>
    tpu.vector_store %arg6[%c3_43, %c0_44, %c0_45], %85 {strides = array<i32>} : memref<8x16x64xf32, #tpu.memory_space<vmem>>, vector<3x16x64xf32>,
    %87 = vector.extract_strided_slice %74 {offsets = [2, 0, 0], sizes = [1, 16, 64], strides = [1, 1, 1]} : vector<3x16x64xf32> to vector<1x16x64xf32>
    %88 = vector.shape_cast %87 : vector<1x16x64xf32> to vector<1x16x64xf32>
    %89 = vector.broadcast %88 : vector<1x16x64xf32> to vector<2x16x64xf32>
    %c6_46 = arith.constant 6 : index
    %c0_47 = arith.constant 0 : index
    %c0_48 = arith.constant 0 : index
    %90 = vector.load %arg6[%c6_46, %c0_47, %c0_48] : memref<8x16x64xf32, #tpu.memory_space<vmem>>, vector<2x16x64xf32>
    %91 = arith.addf %90, %89 : vector<2x16x64xf32>
    %c6_49 = arith.constant 6 : index
    %c0_50 = arith.constant 0 : index
    %c0_51 = arith.constant 0 : index
    %92 = vector.load %arg6[%c6_49, %c0_50, %c0_51] : memref<8x16x64xf32, #tpu.memory_space<vmem>>, vector<2x16x64xf32>
    tpu.vector_store %arg6[%c6_49, %c0_50, %c0_51], %91 {strides = array<i32>} : memref<8x16x64xf32, #tpu.memory_space<vmem>>, vector<2x16x64xf32>,
    %c0_52 = arith.constant 0 : index
    %c0_53 = arith.constant 0 : index
    %c0_54 = arith.constant 0 : index
    %93 = vector.load %arg6[%c0_52, %c0_53, %c0_54] : memref<8x16x64xf32, #tpu.memory_space<vmem>>, vector<8x16x64xf32>
    %c0_55 = arith.constant 0 : index
    %c0_56 = arith.constant 0 : index
    %c0_57 = arith.constant 0 : index
    %c0_58 = arith.constant 0 : index
    %94 = vector.load %arg5[%c0_55, %c0_56, %c0_57, %c0_58] : memref<1x8x16x64xf32, #tpu.memory_space<vmem>>, vector<1x8x16x64xf32>
    %95 = vector.shape_cast %94 : vector<1x8x16x64xf32> to vector<8x16x64xf32>
    %96 = vector.shape_cast %93 : vector<8x16x64xf32> to vector<1x8x16x64xf32>
    tpu.vector_store %arg5[%c0_55, %c0_56, %c0_57, %c0_58], %96 {strides = array<i32>} : memref<1x8x16x64xf32, #tpu.memory_space<vmem>>, vector<1x8x16x64xf32>,
    return
  }
  func.func @transform_0(%arg0: i32, %arg1: i32) -> (i32, i32, i32, i32) {
    %c0_i32 = arith.constant 0 : i32
    %c0_i32_0 = arith.constant 0 : i32
    %c0_i32_1 = arith.constant 0 : i32
    return %arg0, %arg1, %c0_i32, %c0_i32_0 : i32, i32, i32, i32
  }
  func.func @transform_1(%arg0: i32, %arg1: i32) -> (i32, i32, i32, i32) {
    %c0_i32 = arith.constant 0 : i32
    %c0_i32_0 = arith.constant 0 : i32
    %c0_i32_1 = arith.constant 0 : i32
    return %arg0, %arg1, %c0_i32, %c0_i32_0 : i32, i32, i32, i32
  }
  func.func @transform_2(%arg0: i32, %arg1: i32) -> (i32, i32, i32, i32) {
    %c0_i32 = arith.constant 0 : i32
    %c0_i32_0 = arith.constant 0 : i32
    %c0_i32_1 = arith.constant 0 : i32
    return %arg0, %arg1, %c0_i32, %c0_i32_0 : i32, i32, i32, i32
  }
  func.func @transform_3(%arg0: i32, %arg1: i32) -> (i32, i32, i32, i32) {
    %c0_i32 = arith.constant 0 : i32
    %c0_i32_0 = arith.constant 0 : i32
    %c0_i32_1 = arith.constant 0 : i32
    return %arg0, %arg1, %c0_i32, %c0_i32_0 : i32, i32, i32, i32
  }
}

</mosaic_0001>

<bundles_post_ra>
// kernel: tpu_custom_call.1
= control target key start
LH: loop header
LB: loop body
LE: loop exit
PB: predicated region body
PF: predicated region fallthrough
CT: control target
= control target key end

     0   :  { %8 = vsyncpa [#allocation4], 0  ;;  %s1528_s0 = inlined_call_operand.vmem [shape: f32[2,8,8,64], index: 0, kind: input, shape index: {}]   ;;  %s1529_s1 = inlined_call_operand.vmem [shape: f32[2,6,6,64], index: 1, kind: input, shape index: {}]   ;;  %s1530_s2 = inlined_call_operand.hbm [shape: f32[2,16,16,64], index: 2, kind: input, shape index: {}, may-alias: {2,3}]   ;;  %s1531_s3 = inlined_call_operand.hbm [shape: f32[2,16,16,64], index: 3, kind: output, shape index: {}, may-alias: {2,3}]  }
   0x1   :  { %10 = vsyncpa [#allocation4 + $0x1], 0 }
   0x2   :  { %11 = vsyncpa [#allocation5], 0 }
   0x3   :  { %13 = vsyncpa [#allocation5 + $0x1], 0  ;;  %s1097_s12 = smov 0   ;;  %s1099_s13 = smov 0  }
   0x4   :  { %s1101_s14 = smov 0   ;;  %s1103_s15 = smov 0  }
   0x5   :  { %s1105_s16 = smov 0   ;;  %s1107_s17 = smov 0  }
   0x6   :  { %s1109_s18 = smov 0   ;;  %s1111_s19 = smov 0  }
   0x7 LB: > { %s837_s20 = sadd.s32 4294967295, %s1069_s19   ;;  %s838_s21 = sadd.s32 4294967294, %s1069_s19   ;;  %s1069_s19 = sphi %s1111_s19, %s19_s19   ;;  %s1065_s18 = sphi %s1109_s18, %s1550_s18   ;;  %s1061_s17 = sphi %s1107_s17, %s1549_s17   ;;  %s1057_s16 = sphi %s1105_s16, %s1548_s16   ;;  %s1053_s15 = sphi %s1103_s15, %s1547_s15   ;;  %s1049_s14 = sphi %s1101_s14, %s1546_s14   ;;  %s1045_s13 = sphi %s1099_s13, %s1545_s13   ;;  %s1041_s12 = sphi %s1097_s12, %s1544_s12  }
   0x8   : > { %s28_s22 = sadd.s32 1, %s1061_s17  ;;  %s31_s23 = sadd.s32 1, %s1065_s18 }
   0x9   : > { %p29_p0 = scmp.ge.s32.totalorder %s28_s22, 2  ;;  %s96_s24 = sadd.s32 1, %s1049_s14 }
   0xa   : > { %p103_p1 = scmp.ne.s32.totalorder %s1049_s14, %s1045_s13  ;;  %p104_p2 = scmp.eq.s32.totalorder %s1069_s19, 0 }
   0xb   : > { %s1552_s22 = smov (%p29_p0, %s28_s22), 0  ;;  %s1554_s23 = smov (!%p29_p0, %s31_s23), %s1065_s18 }
   0xc   : > { %1534 = sst [smem:[#allocation9_spill]] %s1552_s22  ;;  %s92_s25 = ssub.s32 %s1061_s17, %s1552_s22 }
   0xd   : > { %p1150_p3 = por %p104_p2, %p103_p1  ;;  %p33_p4 = scmp.ge.s32.totalorder %s1554_s23, 2 }
   0xe   : > { %p109_p5 = scmp.ne.s32.totalorder %s1045_s13, %s1041_s12  ;;  %p110_p6 = scmp.eq.s32.totalorder %s837_s20, 0 }
   0xf   : > { %p135_p7 = scmp.eq.s32.totalorder %s837_s20, 3  ;;  %s1556_s23 = smov (%p33_p4, %s1554_s23), 0 }
  0x10   : > { %1536 = sst [smem:[#allocation10_spill]] %s1556_s23  ;;  %p1158_p8 = por %p110_p6, %p109_p5 }
  0x11   : > { %p1162_p9 = por %p135_p7, %p103_p1  ;;  %s91_s29 = ssub.s32 %s1065_s18, %s1556_s23 }
  0x12   : > { %p141_p10 = scmp.eq.s32.totalorder %s838_s21, 3  ;;  %s93_s30 = sor.u32 %s92_s25, %s91_s29 }
  0x13   : > { %p94_p11 = scmp.eq.s32.totalorder %s93_s30, 0  ;;  %p875_p13 = scmp.lt.s32.totalorder %s1069_s19, 4 }
  0x14   : > { %p1168_p12 = por %p141_p10, %p109_p5  ;;  %s187_s5 = sand.u32 1, %s1049_s14  }
  0x15   : > { %s1175_s6 = scalar_select %p94_p11, %s1049_s14, %s96_s24  }
  0x16   : > { %s841_s7 = sshll.u32 %s187_s5, 7  ;;  %s860_s8 = sshll.u32 %s1061_s17, 4 }
  0x17   : > { %s844_s9 = sshll.u32 %s1065_s18, 5  ;;  %s191_s10 = scalar_lea.vmem [#allocation3], %s841_s7 }
  0x18   : > { %s201_s11 = sshll.u32 %s191_s10, 4  ;;  %s198_s20 = sadd.s32 %s860_s8, %s844_s9  ;;  %s202_s11 = int_to_ptr.vmem [resolvable:$true] %s201_s11 }
  0x19   : > { %s845_s23 = sshll.u32 %s198_s20, 7  ;;  %p1181_p0 = pnand %p875_p13, %p1150_p3 }
  0x1a   : > { %s200_s30 = scalar_lea.hbm %s1530_s2, %s845_s23  ;;  %s188_s24 = scalar_lea.sflag [#allocation4], %s187_s5 }
  0x1b   : > { %p947_p1 = pneg %p1181_p0  ;;  %s958_s22 = scalar_lea.vmem %s202_s11, 2048 }
  0x1c   : > { %p959_p2 = scmp.ne.s32.totalorder %s202_s11, %s958_s22  ;;  %s1071_s7 = smov [#allocation3]  }
  0x1d   : > { %s963_s8 = sshll.u32 %s1071_s7, 4  ;;  %s964_s8 = int_to_ptr.vmem [resolvable:$false] %s963_s8 }
  0x1e   : > { %p961_p4 = pnand %p959_p2, %p947_p1  ;;  %s965_s26 = scalar_lea.vmem %s964_s8, 4096 }
  0x1f   : > { %p966_p3 = scmp.lt.s32.totalorder %s202_s11, %s964_s8  ;;  %p967_p6 = scmp.lt.s32.totalorder %s965_s26, %s958_s22 }
  0x20   : > { %p962_p5 = pneg %p961_p4 }
  0x21   : > { %p968_p7 = por %p967_p6, %p966_p3 }
  0x23   : > { %p969_p10 = pnand %p968_p7, %p962_p5 }
  0x25   : > { %972 = shalt.err (!%p969_p10)
}
  0x26   : > { %s1072_s9 = smov 128   ;;  %s1073_s23 = smov 8  }
  0x27   : > { %870 = dma.hbm_to_vmem [thread:$0]  (!%p1181_p0), %s200_s30, 2048, %s202_s11, %s188_s24, %s1072_s9, %s1072_s9, %s1073_s23  }
  0x28   : > { %p846_p11 = scmp.ge.s32.totalorder %s1069_s19, 1  ;;  %p209_p13 = scmp.lt.s32.totalorder %s1069_s19, 5 }
  0x2a   : > { %p210_p1 = pnand %p846_p11, %p209_p13 }
  0x2b   : > { %s1195_s5 = sand.u32 (!%p210_p1), 1, %s1045_s13  }
  0x2c   : > { %213 = sbr.rel (%p210_p1) target bundleno = 118 (0x76), region = 32  ;;  %s847_s22 = sshll.u32 (!%p210_p1), %s1195_s5, 7 }
  0x2d   : > { %s216_s10 = scalar_lea.sflag (!%p210_p1), [#allocation4], %s1195_s5  ;;  %s1201_s20 = scalar_lea.vmem (!%p210_p1), [#allocation3], %s847_s22 }
  0x31   : > { %1032 = dma.done.wait (%p1158_p8), %s216_s10, 2048  }
  0x32   : > { %1034 = vsyncadd (%p1158_p8), %s216_s10, 4294965248  ;;  %s849_s11 = sshll.u32 %s1053_s15, 2  ;;  %p261_p0 = scmp.lt.s32.totalorder %s1057_s16, 1  ;;  %v319_v0 = vlaneseq  ;;  %vm298_vm0 = vcmask 523264   ;;  %v282_v2 = vld [vmem:[%s1201_s20] sm:$0xff]  ;;  %v283_v3 = vld [vmem:[%s1201_s20 + $0x8] sm:$0xff] }
  0x33   : > { %p263_p2 = scmp.lt.s32.totalorder %s849_s11, 7  ;;  %s270_s29 = smul.u32 3, %s1053_s15  ;;  %v284_v4 = vld [vmem:[%s1201_s20 + $0x10] sm:$0xff]  ;;  %299 = vst.msk [vmem:[#allocation2] sm:$0xff] %vm298_vm0, %v282_v2  ;;  %300 = vst.msk [vmem:[#allocation2 + $0x8] sm:$0xff] %vm298_vm0, %v283_v3  ;;  %v285_v5 = vld [vmem:[%s1201_s20 + $0x18] sm:$0xff] }
  0x34   : > { %s1210_s21 = scalar_select %p261_p0, %s1057_s16, 1  ;;  %v320_v1 = vshrl.u32 %v319_v0, 7  ;;  %301 = vst.msk [vmem:[#allocation2 + $0x10] sm:$0xff] %vm298_vm0, %v284_v4  ;;  %v286_v6 = vld [vmem:[%s1201_s20 + $0x20] sm:$0xff]  ;;  %v287_v7 = vld [vmem:[%s1201_s20 + $0x28] sm:$0xff]  ;;  %302 = vst.msk [vmem:[#allocation2 + $0x18] sm:$0xff] %vm298_vm0, %v285_v5 }
  0x35   : > { %s1558_s11 = smov (!%p263_p2, %s849_s11), 7  ;;  %303 = vst.msk [vmem:[#allocation2 + $0x20] sm:$0xff] %vm298_vm0, %v286_v6  ;;  %304 = vst.msk [vmem:[#allocation2 + $0x28] sm:$0xff] %vm298_vm0, %v287_v7  ;;  %v288_v11 = vld [vmem:[%s1201_s20 + $0x30] sm:$0xff]  ;;  %v289_v12 = vld [vmem:[%s1201_s20 + $0x38] sm:$0xff]  ;;  %p1246_p8 = scmp.lt.s32.totalorder %s270_s29, 5 }
  0x36   : > { %s850_s27 = sshll.u32 %s1210_s21, 3  ;;  %v1223_v8 = vsub.s32 0, %v320_v1  ;;  %v1225_v9 = vsub.s32 1, %v320_v1  ;;  %v1227_v10 = vsub.s32 2, %v320_v1  ;;  %v290_v13 = vld [vmem:[%s1201_s20 + $0x40] sm:$0xff]  ;;  %v1240_v14 = vsub.s32 3, %v320_v1 }
  0x37   : > { %s266_s25 = sadd.s32 %s850_s27, %s1558_s11  ;;  %v1242_v15 = vsub.s32 4, %v320_v1  ;;  %305 = vst.msk [vmem:[#allocation2 + $0x30] sm:$0xff] %vm298_vm0, %v288_v11  ;;  %306 = vst.msk [vmem:[#allocation2 + $0x38] sm:$0xff] %vm298_vm0, %v289_v12  ;;  %v291_v16 = vld [vmem:[%s1201_s20 + $0x48] sm:$0xff]  ;;  %v292_v17 = vld [vmem:[%s1201_s20 + $0x50] sm:$0xff]  ;;  %v1256_v19 = vsub.s32 5, %v320_v1 }
  0x38   : > { %s851_s30 = sshll.u32 %s266_s25, 3  ;;  %307 = vst.msk [vmem:[#allocation2 + $0x40] sm:$0xff] %vm298_vm0, %v290_v13  ;;  %v293_v18 = vld [vmem:[%s1201_s20 + $0x58] sm:$0xff]  ;;  %v1258_v20 = vsub.s32 6, %v320_v1  ;;  %v1260_v21 = vsub.s32 7, %v320_v1  ;;  %308 = vst.msk [vmem:[#allocation2 + $0x48] sm:$0xff] %vm298_vm0, %v291_v16 }
  0x39   : > { %s1238_s8 = scalar_lea.vmem %s1528_s0, %s851_s30  ;;  %309 = vst.msk [vmem:[#allocation2 + $0x50] sm:$0xff] %vm298_vm0, %v292_v17  ;;  %310 = vst.msk [vmem:[#allocation2 + $0x58] sm:$0xff] %vm298_vm0, %v293_v18  ;;  %v294_v22 = vld [vmem:[%s1201_s20 + $0x60] sm:$0xff]  ;;  %v295_v23 = vld [vmem:[%s1201_s20 + $0x68] sm:$0xff]  ;;  %vm447_vm1 = vcmask 1041408   ;;  %vm452_vm2 = vcmask 1043456  }
  0x3a   : > { %v296_v24 = vld [vmem:[%s1201_s20 + $0x70] sm:$0xff]  ;;  %311 = vst.msk [vmem:[#allocation2 + $0x60] sm:$0xff] %vm298_vm0, %v294_v22  ;;  %312 = vst.msk [vmem:[#allocation2 + $0x68] sm:$0xff] %vm298_vm0, %v295_v23  ;;  %v297_v25 = vld [vmem:[%s1201_s20 + $0x78] sm:$0xff]  ;;  %vm457_vm3 = vcmask 1045504   ;;  %s862_s9 = smul.u32 6, %s1210_s21 }
  0x3b   : > { %313 = vst.msk [vmem:[#allocation2 + $0x70] sm:$0xff] %vm298_vm0, %v296_v24  ;;  %v315_v26 = vld [vmem:[%s1238_s8] sm:$0xff]  ;;  %v316_v27 = vld [vmem:[%s1238_s8 + $0x8] sm:$0xff]  ;;  %314 = vst.msk [vmem:[#allocation2 + $0x78] sm:$0xff] %vm298_vm0, %v297_v25  ;;  %s1560_s29 = smov (!%p1246_p8, %s270_s29), 5  ;;  %vm600_vm4 = vcmask 1042432  }
  0x3c   : > { %v322_v28 = vrot.slane %v315_v26, %v1223_v8  ;;  %v338_v29 = vrot.slane %v315_v26, %v1225_v9  ;;  %v354_v30 = vrot.slane %v315_v26, %v1227_v10  ;;  %v370_v31 = vrot.slane %v315_v26, %v1240_v14  ;;  %v474_v37 = vld [vmem:[#allocation2] sm:$0xff]  ;;  %v476_v38 = vld [vmem:[#allocation2 + $0x10] sm:$0xff]  ;;  %v475_v44 = vld [vmem:[#allocation2 + $0x8] sm:$0xff]  ;;  %s1302_s23 = sadd.s32 %s862_s9, %s1560_s29  ;;  %s861_s27 = sshll.u32 %s1053_s15, 4 }
  0x3d   : > { %v386_v32 = vrot.slane %v315_v26, %v1242_v15  ;;  %v402_v33 = vrot.slane %v315_v26, %v1256_v19  ;;  %v418_v34 = vrot.slane %v315_v26, %v1258_v20  ;;  %v434_v35 = vrot.slane %v315_v26, %v1260_v21  ;;  %v477_v45 = vld [vmem:[#allocation2 + $0x18] sm:$0xff]  ;;  %v487_v51 = vld [vmem:[#allocation2 + $0x20] sm:$0xff]  ;;  %v317_v58 = vld [vmem:[%s1238_s8 + $0x10] sm:$0xff]  ;;  %s852_s10 = sshll.u32 %s1302_s23, 3  ;;  %s856_s25 = sshll.u32 %s1057_s16, 5 }
  0x3e   : > { %v448_v36 = vsel %vm447_vm1, %v322_v28, %v338_v29  ;;  %v326_v39 = vrot.slane %v316_v27, %v1223_v8  ;;  %v342_v40 = vrot.slane %v316_v27, %v1225_v9  ;;  %v358_v41 = vrot.slane %v316_v27, %v1227_v10  ;;  %v489_v53 = vld [vmem:[#allocation2 + $0x30] sm:$0xff]  ;;  %v488_v2 = vld [vmem:[#allocation2 + $0x28] sm:$0xff]  ;;  %v490_v4 = vld [vmem:[#allocation2 + $0x38] sm:$0xff]  ;;  %s1334_s21 = scalar_lea.vmem %s1529_s1, %s852_s10  ;;  %s1431_s29 = scalar_lea.vmem [#allocation6], %s847_s22 }
  0x3f   : > { %v453_v42 = vsel %vm452_vm2, %v448_v36, %v354_v30  ;;  %v462_v43 = vsel %vm447_vm1, %v386_v32, %v402_v33  ;;  %v374_v46 = vrot.slane %v316_v27, %v1240_v14  ;;  %v390_v47 = vrot.slane %v316_v27, %v1242_v15  ;;  %v1321_v12 = vld [vmem:[%s1238_s8 + $0x18] sm:$0xff]  ;;  %v500_v25 = vld [vmem:[#allocation2 + $0x40] sm:$0xff]  ;;  %s708_s15 = sadd.s32 %s861_s27, %s856_s25  ;;  %s711_s22 = sshll.u32 %s1431_s29, 4  ;;  %s1467_s22 = int_to_ptr.vmem [resolvable:$true] %s711_s22 }
  0x40   : > { %v458_v48 = vsel %vm457_vm3, %v453_v42, %v370_v31  ;;  %v466_v49 = vsel %vm452_vm2, %v462_v43, %v418_v34  ;;  %v449_v50 = vsel %vm447_vm1, %v326_v39, %v342_v40  ;;  %v406_v52 = vrot.slane %v316_v27, %v1256_v19  ;;  %v501_v31 = vld [vmem:[#allocation2 + $0x48] sm:$0xff]  ;;  %v503_v32 = vld [vmem:[#allocation2 + $0x58] sm:$0xff]  ;;  %v525_v42 = vld [vmem:[%s1334_s21] sm:$0x3f]  ;;  %s857_s16 = sshll.u32 %s708_s15, 7  ;;  %s695_s8 = scalar_lea.sflag [#allocation5], %s1195_s5 }
  0x41   : > { %v478_v54 = vadd.f32 %v474_v37, %v458_v48  ;;  %v470_v55 = vsel %vm457_vm3, %v466_v49, %v434_v35  ;;  %v480_v56 = vadd.f32 %v476_v38, %v458_v48  ;;  %v454_v57 = vsel %vm452_vm2, %v449_v50, %v358_v41  ;;  %s1465_s7 = scalar_lea.hbm %s1531_s3, %s857_s16  ;;  %s973_s26 = scalar_lea.vmem %s1467_s22, 2048 }
  0x42   : > { %v479_v59 = vadd.f32 %v475_v44, %v470_v55  ;;  %v481_v60 = vadd.f32 %v477_v45, %v470_v55  ;;  %v459_v61 = vsel %vm457_vm3, %v454_v57, %v374_v46  ;;  %v422_v62 = vrot.slane %v316_v27, %v1258_v20  ;;  %v513_v46 = vld [vmem:[#allocation2 + $0x60] sm:$0xff]  ;;  %v515_v48 = vld [vmem:[#allocation2 + $0x70] sm:$0xff]  ;;  %v1372_v57 = vld [vmem:[%s1334_s21 + $0x8] sm:$0x3f]  ;;  %p974_p4 = scmp.ne.s32.totalorder %s1467_s22, %s973_s26  ;;  %s1074_s9 = smov [#allocation6]  }
  0x43   : > { %482 = vst.msk [vmem:[#allocation2] sm:$0xff] %vm298_vm0, %v478_v54  ;;  %484 = vst.msk [vmem:[#allocation2 + $0x10] sm:$0xff] %vm298_vm0, %v480_v56  ;;  %v491_v63 = vadd.f32 %v487_v51, %v459_v61  ;;  %v438_v0 = vrot.slane %v316_v27, %v1260_v21  ;;  %v463_v1 = vsel %vm447_vm1, %v390_v47, %v406_v52  ;;  %v502_v27 = vld [vmem:[#allocation2 + $0x50] sm:$0xff]  ;;  %s977_s23 = sshll.u32 %s1074_s9, 4  ;;  %s978_s23 = int_to_ptr.vmem [resolvable:$false] %s977_s23 }
  0x44   : > { %v493_v3 = vadd.f32 %v489_v53, %v459_v61  ;;  %483 = vst.msk [vmem:[#allocation2 + $0x8] sm:$0xff] %vm298_vm0, %v479_v59  ;;  %485 = vst.msk [vmem:[#allocation2 + $0x18] sm:$0xff] %vm298_vm0, %v481_v60  ;;  %v467_v5 = vsel %vm452_vm2, %v463_v1, %v422_v62  ;;  %v330_v6 = vrot.slane %v317_v58, %v1223_v8  ;;  %v514_v59 = vld [vmem:[#allocation2 + $0x68] sm:$0xff]  ;;  %p975_p5 = pnand %p974_p4, %p1162_p9  ;;  %s979_s10 = scalar_lea.vmem %s978_s23, 4096 }
  0x45   : > { %v346_v7 = vrot.slane %v317_v58, %v1225_v9  ;;  %v362_v11 = vrot.slane %v317_v58, %v1227_v10  ;;  %495 = vst.msk [vmem:[#allocation2 + $0x20] sm:$0xff] %vm298_vm0, %v491_v63  ;;  %v471_v13 = vsel %vm457_vm3, %v467_v5, %v438_v0  ;;  %v378_v16 = vrot.slane %v317_v58, %v1240_v14  ;;  %p980_p6 = scmp.lt.s32.totalorder %s1467_s22, %s978_s23  ;;  %p981_p7 = scmp.lt.s32.totalorder %s979_s10, %s973_s26 }
  0x46   : > { %497 = vst.msk [vmem:[#allocation2 + $0x30] sm:$0xff] %vm298_vm0, %v493_v3  ;;  %v394_v17 = vrot.slane %v317_v58, %v1242_v15  ;;  %v410_v18 = vrot.slane %v317_v58, %v1256_v19  ;;  %v492_v22 = vadd.f32 %v488_v2, %v471_v13  ;;  %v494_v23 = vadd.f32 %v490_v4, %v471_v13  ;;  %p976_p3 = pneg %p975_p5 }
  0x47   : > { %v450_v24 = vsel %vm447_vm1, %v330_v6, %v346_v7  ;;  %v426_v26 = vrot.slane %v317_v58, %v1258_v20  ;;  %v442_v29 = vrot.slane %v317_v58, %v1260_v21  ;;  %v334_v33 = vrot.slane %v1321_v12, %v1223_v8  ;;  %p982_p10 = por %p981_p7, %p980_p6 }
  0x48   : > { %v455_v28 = vsel %vm452_vm2, %v450_v24, %v362_v11  ;;  %v464_v30 = vsel %vm447_vm1, %v394_v17, %v410_v18  ;;  %496 = vst.msk [vmem:[#allocation2 + $0x28] sm:$0xff] %vm298_vm0, %v492_v22  ;;  %498 = vst.msk [vmem:[#allocation2 + $0x38] sm:$0xff] %vm298_vm0, %v494_v23  ;;  %v350_v36 = vrot.slane %v1321_v12, %v1225_v9 }
  0x49   : > { %v460_v34 = vsel %vm457_vm3, %v455_v28, %v378_v16  ;;  %v468_v35 = vsel %vm452_vm2, %v464_v30, %v426_v26  ;;  %v366_v37 = vrot.slane %v1321_v12, %v1227_v10  ;;  %v382_v41 = vrot.slane %v1321_v12, %v1240_v14  ;;  %p983_p11 = pnand %p982_p10, %p976_p3 }
  0x4a   : > { %v504_v38 = vadd.f32 %v500_v25, %v460_v34  ;;  %v472_v39 = vsel %vm457_vm3, %v468_v35, %v442_v29  ;;  %v506_v40 = vadd.f32 %v502_v27, %v460_v34  ;;  %v451_v45 = vsel %vm447_vm1, %v334_v33, %v350_v36  ;;  %v613_v61 = vld [vmem:[#allocation2] sm:$0xff]  ;;  %v615_v3 = vld [vmem:[#allocation2 + $0x10] sm:$0xff] }
  0x4b   : > { %v505_v43 = vadd.f32 %v501_v31, %v472_v39  ;;  %v507_v44 = vadd.f32 %v503_v32, %v472_v39  ;;  %v398_v47 = vrot.slane %v1321_v12, %v1242_v15  ;;  %v456_v49 = vsel %vm452_vm2, %v451_v45, %v366_v37  ;;  %v614_v7 = vld [vmem:[#allocation2 + $0x8] sm:$0xff]  ;;  %v616_v11 = vld [vmem:[#allocation2 + $0x18] sm:$0xff]  ;;  %v527_v29 = vld [vmem:[%s1334_s21 + $0x10] sm:$0x3f] }
  0x4c   : > { %508 = vst.msk [vmem:[#allocation2 + $0x40] sm:$0xff] %vm298_vm0, %v504_v38  ;;  %510 = vst.msk [vmem:[#allocation2 + $0x50] sm:$0xff] %vm298_vm0, %v506_v40  ;;  %v414_v50 = vrot.slane %v1321_v12, %v1256_v19  ;;  %v430_v51 = vrot.slane %v1321_v12, %v1258_v20  ;;  %v446_v52 = vrot.slane %v1321_v12, %v1260_v21  ;;  %v516_v21 = vld [vmem:[#allocation2 + $0x78] sm:$0xff]  ;;  %v617_v4 = vld [vmem:[#allocation2 + $0x20] sm:$0xff] }
  0x4d   : > { %509 = vst.msk [vmem:[#allocation2 + $0x48] sm:$0xff] %vm298_vm0, %v505_v43  ;;  %511 = vst.msk [vmem:[#allocation2 + $0x58] sm:$0xff] %vm298_vm0, %v507_v44  ;;  %v461_v53 = vsel %vm457_vm3, %v456_v49, %v382_v41  ;;  %v531_v54 = vrot.slane %v525_v42, %v1223_v8  ;;  %v543_v55 = vrot.slane %v525_v42, %v1225_v9  ;;  %v632_v28 = vld [vmem:[#allocation2 + $0x30] sm:$0xff] }
  0x4e   : > { %v555_v56 = vrot.slane %v525_v42, %v1227_v10  ;;  %v517_v58 = vadd.f32 %v513_v46, %v461_v53  ;;  %v465_v20 = vsel %vm447_vm1, %v398_v47, %v414_v50  ;;  %v519_v60 = vadd.f32 %v515_v48, %v461_v53 }
  0x4f   : > { %v567_v62 = vrot.slane %v525_v42, %v1240_v14  ;;  %v469_v63 = vsel %vm452_vm2, %v465_v20, %v430_v51  ;;  %v601_v0 = vsel %vm600_vm4, %v531_v54, %v543_v55  ;;  %v579_v1 = vrot.slane %v525_v42, %v1242_v15  ;;  %v618_v12 = vld [vmem:[#allocation2 + $0x28] sm:$0xff]  ;;  %v633_v41 = vld [vmem:[#allocation2 + $0x38] sm:$0xff] }
  0x50   : > { %v591_v2 = vrot.slane %v525_v42, %v1256_v19  ;;  %521 = vst.msk [vmem:[#allocation2 + $0x60] sm:$0xff] %vm298_vm0, %v517_v58  ;;  %v473_v5 = vsel %vm457_vm3, %v469_v63, %v446_v52  ;;  %523 = vst.msk [vmem:[#allocation2 + $0x70] sm:$0xff] %vm298_vm0, %v519_v60  ;;  %v604_v6 = vsel %vm457_vm3, %v601_v0, %v555_v56 }
  0x51   : > { %v535_v13 = vrot.slane %v1372_v57, %v1223_v8  ;;  %v547_v16 = vrot.slane %v1372_v57, %v1225_v9  ;;  %v518_v17 = vadd.f32 %v514_v59, %v473_v5  ;;  %v520_v18 = vadd.f32 %v516_v21, %v473_v5 }
  0x52   : > { %v619_v22 = vadd.f32 %v613_v61, %v604_v6  ;;  %v607_v23 = vsel %vm600_vm4, %v567_v62, %v579_v1  ;;  %v621_v25 = vadd.f32 %v615_v3, %v604_v6  ;;  %v623_v26 = vadd.f32 %v617_v4, %v604_v6 }
  0x53   : > { %v610_v24 = vsel %vm457_vm3, %v607_v23, %v591_v2  ;;  %v559_v27 = vrot.slane %v1372_v57, %v1227_v10  ;;  %522 = vst.msk [vmem:[#allocation2 + $0x68] sm:$0xff] %vm298_vm0, %v518_v17  ;;  %524 = vst.msk [vmem:[#allocation2 + $0x78] sm:$0xff] %vm298_vm0, %v520_v18  ;;  %v602_v33 = vsel %vm600_vm4, %v535_v13, %v547_v16  ;;  %v634_v34 = vld [vmem:[#allocation2 + $0x40] sm:$0xff]  ;;  %v636_v35 = vld [vmem:[#allocation2 + $0x50] sm:$0xff] }
  0x54   : > { %625 = vst.msk [vmem:[#allocation2] sm:$0xff] %vm298_vm0, %v619_v22  ;;  %v620_v30 = vadd.f32 %v614_v7, %v610_v24  ;;  %v622_v31 = vadd.f32 %v616_v11, %v610_v24  ;;  %v624_v32 = vadd.f32 %v618_v12, %v610_v24  ;;  %627 = vst.msk [vmem:[#allocation2 + $0x10] sm:$0xff] %vm298_vm0, %v621_v25  ;;  %v635_v43 = vld [vmem:[#allocation2 + $0x48] sm:$0xff]  ;;  %v637_v45 = vld [vmem:[#allocation2 + $0x58] sm:$0xff] }
  0x55   : > { %629 = vst.msk [vmem:[#allocation2 + $0x20] sm:$0xff] %vm298_vm0, %v623_v26  ;;  %v605_v36 = vsel %vm457_vm3, %v602_v33, %v559_v27  ;;  %v571_v37 = vrot.slane %v1372_v57, %v1240_v14  ;;  %v583_v38 = vrot.slane %v1372_v57, %v1242_v15  ;;  %v595_v39 = vrot.slane %v1372_v57, %v1256_v19 }
  0x56   : > { %626 = vst.msk [vmem:[#allocation2 + $0x8] sm:$0xff] %vm298_vm0, %v620_v30  ;;  %628 = vst.msk [vmem:[#allocation2 + $0x18] sm:$0xff] %vm298_vm0, %v622_v31  ;;  %v638_v40 = vadd.f32 %v632_v28, %v605_v36  ;;  %v640_v42 = vadd.f32 %v634_v34, %v605_v36  ;;  %v642_v44 = vadd.f32 %v636_v35, %v605_v36 }
  0x57   : > { %630 = vst.msk [vmem:[#allocation2 + $0x28] sm:$0xff] %vm298_vm0, %v624_v32  ;;  %v539_v46 = vrot.slane %v527_v29, %v1223_v8  ;;  %v608_v47 = vsel %vm600_vm4, %v571_v37, %v583_v38  ;;  %v551_v48 = vrot.slane %v527_v29, %v1225_v9  ;;  %v563_v49 = vrot.slane %v527_v29, %v1227_v10  ;;  %v650_v52 = vld [vmem:[#allocation2 + $0x60] sm:$0xff]  ;;  %v652_v9 = vld [vmem:[#allocation2 + $0x70] sm:$0xff] }
  0x58   : > { %v575_v50 = vrot.slane %v527_v29, %v1240_v14  ;;  %644 = vst.msk [vmem:[#allocation2 + $0x30] sm:$0xff] %vm298_vm0, %v638_v40  ;;  %v611_v51 = vsel %vm457_vm3, %v608_v47, %v595_v39  ;;  %646 = vst.msk [vmem:[#allocation2 + $0x40] sm:$0xff] %vm298_vm0, %v640_v42  ;;  %v587_v8 = vrot.slane %v527_v29, %v1242_v15 }
  0x59   : > { %648 = vst.msk [vmem:[#allocation2 + $0x50] sm:$0xff] %vm298_vm0, %v642_v44  ;;  %v599_v53 = vrot.slane %v527_v29, %v1256_v19  ;;  %v639_v54 = vadd.f32 %v633_v41, %v611_v51  ;;  %v641_v10 = vadd.f32 %v635_v43, %v611_v51  ;;  %v643_v55 = vadd.f32 %v637_v45, %v611_v51 }
  0x5a   : > { %v603_v14 = vsel %vm600_vm4, %v539_v46, %v551_v48  ;;  %v609_v57 = vsel %vm600_vm4, %v575_v50, %v587_v8  ;;  %v651_v58 = vld [vmem:[#allocation2 + $0x68] sm:$0xff]  ;;  %v653_v59 = vld [vmem:[#allocation2 + $0x78] sm:$0xff] }
  0x5b   : > { %v606_v56 = vsel %vm457_vm3, %v603_v14, %v563_v49  ;;  %645 = vst.msk [vmem:[#allocation2 + $0x38] sm:$0xff] %vm298_vm0, %v639_v54  ;;  %647 = vst.msk [vmem:[#allocation2 + $0x48] sm:$0xff] %vm298_vm0, %v641_v10  ;;  %v612_v19 = vsel %vm457_vm3, %v609_v57, %v599_v53  ;;  %v662_v60 = vld [vmem:[#allocation2] sm:$0xff]  ;;  %v664_v62 = vld [vmem:[#allocation2 + $0x10] sm:$0xff] }
  0x5c   : > { %649 = vst.msk [vmem:[#allocation2 + $0x58] sm:$0xff] %vm298_vm0, %v643_v55  ;;  %v654_v15 = vadd.f32 %v650_v52, %v606_v56  ;;  %v656_v20 = vadd.f32 %v652_v9, %v606_v56  ;;  %v655_v21 = vadd.f32 %v651_v58, %v612_v19  ;;  %v657_v61 = vadd.f32 %v653_v59, %v612_v19  ;;  %v666_v63 = vld [vmem:[#allocation2 + $0x20] sm:$0xff] }
  0x5d   : > { %678 = vst.msk [vmem:[%s1431_s29] sm:$0xff] %vm298_vm0, %v662_v60  ;;  %v663_v0 = vld [vmem:[#allocation2 + $0x8] sm:$0xff]  ;;  %680 = vst.msk [vmem:[%s1431_s29 + $0x10] sm:$0xff] %vm298_vm0, %v664_v62  ;;  %v665_v1 = vld [vmem:[#allocation2 + $0x18] sm:$0xff] }
  0x5e   : > { %658 = vst.msk [vmem:[#allocation2 + $0x60] sm:$0xff] %vm298_vm0, %v654_v15  ;;  %660 = vst.msk [vmem:[#allocation2 + $0x70] sm:$0xff] %vm298_vm0, %v656_v20  ;;  %v667_v2 = vld [vmem:[#allocation2 + $0x28] sm:$0xff] }
  0x5f   : > { %682 = vst.msk [vmem:[%s1431_s29 + $0x20] sm:$0xff] %vm298_vm0, %v666_v63  ;;  %659 = vst.msk [vmem:[#allocation2 + $0x68] sm:$0xff] %vm298_vm0, %v655_v21  ;;  %v668_v3 = vld [vmem:[#allocation2 + $0x30] sm:$0xff]  ;;  %v670_v4 = vld [vmem:[#allocation2 + $0x40] sm:$0xff] }
  0x60   : > { %661 = vst.msk [vmem:[#allocation2 + $0x78] sm:$0xff] %vm298_vm0, %v657_v61  ;;  %679 = vst.msk [vmem:[%s1431_s29 + $0x8] sm:$0xff] %vm298_vm0, %v663_v0  ;;  %v672_v5 = vld [vmem:[#allocation2 + $0x50] sm:$0xff] }
  0x61   : > { %681 = vst.msk [vmem:[%s1431_s29 + $0x18] sm:$0xff] %vm298_vm0, %v665_v1  ;;  %683 = vst.msk [vmem:[%s1431_s29 + $0x28] sm:$0xff] %vm298_vm0, %v667_v2 }
  0x62   : > { %684 = vst.msk [vmem:[%s1431_s29 + $0x30] sm:$0xff] %vm298_vm0, %v668_v3  ;;  %686 = vst.msk [vmem:[%s1431_s29 + $0x40] sm:$0xff] %vm298_vm0, %v670_v4  ;;  %v669_v6 = vld [vmem:[#allocation2 + $0x38] sm:$0xff]  ;;  %v671_v7 = vld [vmem:[#allocation2 + $0x48] sm:$0xff] }
  0x63   : > { %688 = vst.msk [vmem:[%s1431_s29 + $0x50] sm:$0xff] %vm298_vm0, %v672_v5  ;;  %v673_v11 = vld [vmem:[#allocation2 + $0x58] sm:$0xff]  ;;  %685 = vst.msk [vmem:[%s1431_s29 + $0x38] sm:$0xff] %vm298_vm0, %v669_v6 }
  0x64   : > { %687 = vst.msk [vmem:[%s1431_s29 + $0x48] sm:$0xff] %vm298_vm0, %v671_v7  ;;  %689 = vst.msk [vmem:[%s1431_s29 + $0x58] sm:$0xff] %vm298_vm0, %v673_v11 }
  0x65   : > { %v674_v12 = vld [vmem:[#allocation2 + $0x60] sm:$0xff]  ;;  %v676_v13 = vld [vmem:[#allocation2 + $0x70] sm:$0xff] }
  0x66   : > { %690 = vst.msk [vmem:[%s1431_s29 + $0x60] sm:$0xff] %vm298_vm0, %v674_v12  ;;  %v675_v16 = vld [vmem:[#allocation2 + $0x68] sm:$0xff]  ;;  %692 = vst.msk [vmem:[%s1431_s29 + $0x70] sm:$0xff] %vm298_vm0, %v676_v13 }
  0x67   : > { %v677_v17 = vld [vmem:[#allocation2 + $0x78] sm:$0xff]  ;;  %691 = vst.msk [vmem:[%s1431_s29 + $0x68] sm:$0xff] %vm298_vm0, %v675_v16 }
  0x68   : > { %693 = vst.msk [vmem:[%s1431_s29 + $0x78] sm:$0xff] %vm298_vm0, %v677_v17 }
  0x69   : > { %986 = shalt.err (!%p983_p11)
}
  0x6a   : > { %s987_s20 = scalar_lea.hbm %s1465_s7, 2048  ;;  %s991_s27 = scalar_lea.hbm %s1531_s3, 8192 }
  0x6b   : > { %p988_p13 = scmp.ne.s32.totalorder %s1465_s7, %s987_s20  ;;  %p992_p2 = scmp.lt.s32.totalorder %s1465_s7, %s1531_s3 }
  0x6c   : > { %p993_p8 = scmp.lt.s32.totalorder %s991_s27, %s987_s20 }
  0x6d   : > { %p989_p1 = pnand %p988_p13, %p1162_p9 }
  0x6e   : > { %p994_p4 = por %p993_p8, %p992_p2 }
  0x6f   : > { %p990_p0 = pneg %p989_p1 }
  0x71   : > { %p995_p5 = pnand %p994_p4, %p990_p0 }
  0x73   : > { %998 = shalt.err (!%p995_p5)
}
  0x74   : > { %s1075_s15 = smov 128   ;;  %s1076_s16 = smov 8  }
  0x75   : > { %865 = dma.vmem_to_hbm [thread:$0]  (%p1162_p9), %s1467_s22, 2048, %s1465_s7, %s695_s8, %s1075_s15, %s1075_s15, %s1076_s16  }
  0x76 PF: > { %p876_p3 = scmp.ge.s32.totalorder %s1069_s19, 2  ;;  %s726_s30 = sand.u32 1, %s1041_s12  }
  0x77   : > { %s727_s24 = scalar_lea.sflag [#allocation5], %s726_s30 }
  0x78   : > { %p872_p6 = pnand %p876_p3, %p1168_p12 }
  0x7a   : > { %p873_p7 = pneg %p872_p6 }
  0x7c   : > { %1036 = dma.done.wait (%p873_p7), %s727_s24, 2048  }
  0x7d   : > { %1038 = vsyncadd (%p873_p7), %s727_s24, 4294965248  ;;  %s19_s19 = sadd.s32 1, %s1069_s19   ;;  %s1542_s28 = sld [smem:[#allocation9_spill]] }
  0x7e   : > { %p16_p10 = scmp.ge.s32.totalorder %s19_s19, 6   ;;  %s1543_s5 = sld [smem:[#allocation10_spill]] }
  0x7f   : > { %s1544_s12 = smov %s1045_s13  ;;  %s1545_s13 = smov %s1049_s14 }
  0x80   : > { %s1546_s14 = smov %s1175_s6  ;;  %s1547_s15 = smov %s1061_s17 }
  0x81   : > { %s1548_s16 = smov %s1065_s18  ;;  %18 = sbr.rel (!%p16_p10) target bundleno = 7 (0x7), region = 87 }
  0x83   : > { %s1549_s17 = smov %s1542_s28 }
  0x84   : > { %s1550_s18 = smov %s1543_s5 }
  0x86   :  { %732 = vsyncpa [#allocation4], 1 }
  0x87   :  { %734 = vsyncpa [#allocation4 + $0x1], 1 }
  0x88   :  { %735 = vsyncpa [#allocation5], 1 }
  0x89   :  { %737 = vsyncpa [#allocation5 + $0x1], 1 }

</bundles_post_ra>
